<compile_context>
chip_gen: v6e
topology: v6e:2x2x1
jax: 0.10.0
libtpu: 0.0.40
codegen_flags: <defaults>
</compile_context>

<pallas_src>
import jax
import jax.numpy as jnp
from jax.experimental import pallas as pl
from jax.experimental.pallas import tpu as pltpu


# ----------------------------------------------------------------------------
# Pallas kernel: the whole UBlock forward for one batch element, channel-first.
#
# Every Conv1d / ConvTranspose1d (k=3, stride=1, pad=1) is one MXU matmul:
#     y = W_flat @ [v[t-1]; v[t]; v[t+1]] + b        (W_flat: (Co, 3*Ci))
# ConvTranspose1d(stride=1,k=3,pad=1) == Conv1d with tap-flipped / channel-swapped
# weights; that re-layout (and the tap flattening) is done once in the wrapper.
# The channel-concat cat([x, ctx], dim=1) is a sublane concat feeding a single
# fused conv1 matmul.
# ----------------------------------------------------------------------------
def ublock_kernel(xup_ref, ctx_ref,
                  wup_ref, bup_ref,
                  wctx_ref, bctx_ref,
                  w1_ref, b1_ref,
                  w2_ref, b2_ref,
                  out_ref):
    f32 = jnp.float32

    def shift3(v):
        # (C, T) -> (3C, T): row-blocks [v[t-1]; v[t]; v[t+1]], zero at the edges
        # (== the conv's padding=1).  Pure static lane slices + concats: O(T*C),
        # no (T,T) operands, no MXU work.
        C, T = v.shape
        z = jnp.zeros((C, 1), v.dtype)
        vm1 = jnp.concatenate([z, v[:, :T - 1]], axis=1)   # v[t-1], 0 at t=0
        vp1 = jnp.concatenate([v[:, 1:], z], axis=1)       # v[t+1], 0 at t=T-1
        return jnp.concatenate([vm1, v, vp1], axis=0)

    def conv3(v, w_ref, b_ref):
        # All 3 taps fused into ONE matmul: (Co, 3C) @ (3C, T) -> (Co, T).
        # f32 accumulation; the (Co, T) result is lane-dense in T.
        x3 = shift3(v.astype(w_ref.dtype))
        return jnp.dot(w_ref[...], x3, preferred_element_type=f32) + b_ref[...]

    def lrelu(y):  # nn.LeakyReLU() default negative_slope = 0.01, in f32
        return jnp.where(y > 0, y, 0.01 * y)

    xu = xup_ref[0]      # (Cin, T)  nearest-upsampled x, channel-first (NCL native)
    c = ctx_ref[0]       # (Cin, T)

    hx = conv3(xu, wup_ref, bup_ref)          # up_conv (ConvTranspose1d, conv form)
    hc = conv3(c, wctx_ref, bctx_ref)         # conv_ctx
    h = jnp.concatenate([hx, hc], axis=0)     # torch.cat([x, ctx], dim=1), (2*Cout, T)
    h1 = lrelu(conv3(h, w1_ref, b1_ref))      # conv1: single fused matmul over 2*Cout ch.
    h2 = lrelu(conv3(h1, w2_ref, b2_ref))     # conv2

    out_ref[0] = h2.astype(out_ref.dtype)     # (Cout, T) -- T (large) in lanes


# ----------------------------------------------------------------------------
# Wrapper: weight re-layout + pallas_call (no activation transposes anywhere)
# ----------------------------------------------------------------------------
def ublock_pallas(x, ctx, params, compute_dtype=jnp.float32):
    """x: (N, Cin, L), ctx: (N, Cin, 2L) — PyTorch NCL layout. Returns (N, Cout, 2L).

    compute_dtype=jnp.bfloat16 halves MXU/HBM cost of the matmul operands on
    v6e/v7x (accumulation, bias and LeakyReLU stay f32)."""
    N, Cin, L = x.shape
    T = 2 * L
    Cout = params["b_up"].shape[0]
    cd = compute_dtype

    # Nearest-neighbor x2 upsample, kept in NCL layout (small tensor; see TODO).
    x_up = jnp.repeat(x, 2, axis=2).astype(cd)            # (N, Cin, T)
    ctx_c = ctx.astype(cd)                                 # (N, Cin, T)

    def convT_to_flat(w):
        # ConvTranspose1d weight (Ci, Co, 3) -> equivalent conv weight, tap-flattened:
        # W_flat[o, k*Ci + i] = w[i, o, 2-k]
        wc = jnp.flip(w, axis=2).transpose(1, 0, 2)        # (Co, Ci, 3)
        return wc.transpose(0, 2, 1).reshape(Cout, -1)     # (Co, 3*Ci)

    def conv_to_flat(w):
        # Conv1d weight (Co, Ci, 3) -> W_flat[o, k*Ci + i] = w[o, i, k]
        return w.transpose(0, 2, 1).reshape(Cout, -1)      # (Co, 3*Ci)

    w_up = convT_to_flat(params["w_up"]).astype(cd)        # (Cout, 3*Cin)
    w_ctx = convT_to_flat(params["w_ctx"]).astype(cd)      # (Cout, 3*Cin)
    w1 = conv_to_flat(params["w1"]).astype(cd)             # (Cout, 6*Cout)
    w2 = conv_to_flat(params["w2"]).astype(cd)             # (Cout, 3*Cout)

    b_up = params["b_up"].reshape(Cout, 1).astype(jnp.float32)
    b_ctx = params["b_ctx"].reshape(Cout, 1).astype(jnp.float32)
    b1 = params["b1"].reshape(Cout, 1).astype(jnp.float32)
    b2 = params["b2"].reshape(Cout, 1).astype(jnp.float32)

    def full(shape):
        return pl.BlockSpec(shape, lambda n, _nd=len(shape): (0,) * _nd)

    out = pl.pallas_call(
        ublock_kernel,
        out_shape=jax.ShapeDtypeStruct((N, Cout, T), jnp.float32),
        grid=(N,),
        in_specs=[
            pl.BlockSpec((1, Cin, T), lambda n: (n, 0, 0)),   # x (upsampled), NCL
            pl.BlockSpec((1, Cin, T), lambda n: (n, 0, 0)),   # ctx, NCL
            full((Cout, 3 * Cin)), full((Cout, 1)),           # up_conv
            full((Cout, 3 * Cin)), full((Cout, 1)),           # conv_ctx
            full((Cout, 6 * Cout)), full((Cout, 1)),          # conv1 (taps + split fused)
            full((Cout, 3 * Cout)), full((Cout, 1)),          # conv2
        ],
        out_specs=pl.BlockSpec((1, Cout, T), lambda n: (n, 0, 0)),  # NCL, lane-dense in T
        compiler_params=pltpu.CompilerParams(dimension_semantics=("parallel",)),
    )(x_up, ctx_c, w_up, b_up, w_ctx, b_ctx, w1, b1, w2, b2)

    return out   # already (N, Cout, T) — no transpose back needed


# ----------------------------------------------------------------------------
# Pure-JAX reference implementing the PyTorch semantics directly (NCL layout)
# ----------------------------------------------------------------------------
def _convT1d_ref(x, w, b):
    # PyTorch ConvTranspose1d, stride=1, k=3, padding=1. x: (N,Ci,L), w: (Ci,Co,3)
    N, Ci, L = x.shape
    Co = w.shape[1]
    yf = jnp.zeros((N, Co, L + 2), jnp.float32)
    for k in range(3):
        yf = yf.at[:, :, k:k + L].add(jnp.einsum("ncl,co->nol", x, w[:, :, k]))
    return yf[:, :, 1:L + 1] + b[None, :, None]


def _conv1d_ref(x, w, b):
    # PyTorch Conv1d, stride=1, k=3, padding=1. x: (N,Ci,L), w: (Co,Ci,3)
    L = x.shape[2]
    xp = jnp.pad(x, ((0, 0), (0, 0), (1, 1)))
    y = sum(jnp.einsum("ncl,oc->nol", xp[:, :, k:k + L], w[:, :, k]) for k in range(3))
    return y + b[None, :, None]


def ublock_ref(x, ctx, p):
    lrelu = lambda y: jnp.where(y > 0, y, 0.01 * y)
    xu = jnp.repeat(x, 2, axis=2)
    hx = _convT1d_ref(xu, p["w_up"], p["b_up"])
    hc = _convT1d_ref(ctx, p["w_ctx"], p["b_ctx"])
    h = jnp.concatenate([hx, hc], axis=1)
    h1 = lrelu(_conv1d_ref(h, p["w1"], p["b1"]))
    return lrelu(_conv1d_ref(h1, p["w2"], p["b2"]))


# ----------------------------------------------------------------------------
if __name__ == "__main__":
    N, Cin, Cout, L = 2, 4, 8, 8        # x: (2,4,8), ctx: (2,4,16), out: (2,8,16)

    key = jax.random.PRNGKey(0)
    ks = jax.random.split(key, 10)
    params = {
        # ConvTranspose1d weights: (in, out, k)
        "w_up":  0.1 * jax.random.normal(ks[0], (Cin, Cout, 3), jnp.float32),
        "b_up":  0.1 * jax.random.normal(ks[1], (Cout,), jnp.float32),
        "w_ctx": 0.1 * jax.random.normal(ks[2], (Cin, Cout, 3), jnp.float32),
        "b_ctx": 0.1 * jax.random.normal(ks[3], (Cout,), jnp.float32),
        # Conv1d weights: (out, in, k)
        "w1": 0.1 * jax.random.normal(ks[4], (Cout, 2 * Cout, 3), jnp.float32),
        "b1": 0.1 * jax.random.normal(ks[5], (Cout,), jnp.float32),
        "w2": 0.1 * jax.random.normal(ks[6], (Cout, Cout, 3), jnp.float32),
        "b2": 0.1 * jax.random.normal(ks[7], (Cout,), jnp.float32),
    }

    x = jax.random.normal(ks[8], (N, Cin, L), jnp.float32)
    ctx = jax.random.normal(ks[9], (N, Cin, 2 * L), jnp.float32)

    out = jax.block_until_ready(ublock_pallas(x, ctx, params))
    ref = jax.block_until_ready(ublock_ref(x, ctx, params))

    assert out.shape == (N, Cout, 2 * L), out.shape
    assert jnp.allclose(out, ref, atol=1e-4, rtol=1e-4), float(jnp.max(jnp.abs(out - ref)))
    print("KERNEL_OK")
</pallas_src>

<mosaic_0001>
module attributes {stable_mosaic.version = 11 : i64} {
  func.func @ublock_kernel(%arg0: i32, %arg1: memref<1x4x16xf32, #tpu.memory_space<vmem>>, %arg2: memref<1x4x16xf32, #tpu.memory_space<vmem>>, %arg3: memref<8x12xf32, #tpu.memory_space<vmem>>, %arg4: memref<8x1xf32, #tpu.memory_space<vmem>>, %arg5: memref<8x12xf32, #tpu.memory_space<vmem>>, %arg6: memref<8x1xf32, #tpu.memory_space<vmem>>, %arg7: memref<8x48xf32, #tpu.memory_space<vmem>>, %arg8: memref<8x1xf32, #tpu.memory_space<vmem>>, %arg9: memref<8x24xf32, #tpu.memory_space<vmem>>, %arg10: memref<8x1xf32, #tpu.memory_space<vmem>>, %arg11: memref<1x8x16xf32, #tpu.memory_space<vmem>>) attributes {dimension_semantics = [#tpu.dimension_semantics<parallel>], iteration_bounds = array<i64: 2>, scalar_prefetch = 0 : i64, scratch_operands = 0 : i64, tpu.core_type = #tpu.core_type<tc>, window_params = [{transform_indices = @transform_0, window_bounds = array<i64: 1, 4, 16>}, {transform_indices = @transform_1, window_bounds = array<i64: 1, 4, 16>}, {pipeline_mode = #tpu.pipeline_mode<synchronous>, transform_indices = @transform_2, window_bounds = array<i64: 8, 12>}, {pipeline_mode = #tpu.pipeline_mode<synchronous>, transform_indices = @transform_3, window_bounds = array<i64: 8, 1>}, {pipeline_mode = #tpu.pipeline_mode<synchronous>, transform_indices = @transform_4, window_bounds = array<i64: 8, 12>}, {pipeline_mode = #tpu.pipeline_mode<synchronous>, transform_indices = @transform_5, window_bounds = array<i64: 8, 1>}, {pipeline_mode = #tpu.pipeline_mode<synchronous>, transform_indices = @transform_6, window_bounds = array<i64: 8, 48>}, {pipeline_mode = #tpu.pipeline_mode<synchronous>, transform_indices = @transform_7, window_bounds = array<i64: 8, 1>}, {pipeline_mode = #tpu.pipeline_mode<synchronous>, transform_indices = @transform_8, window_bounds = array<i64: 8, 24>}, {pipeline_mode = #tpu.pipeline_mode<synchronous>, transform_indices = @transform_9, window_bounds = array<i64: 8, 1>}, {transform_indices = @transform_10, window_bounds = array<i64: 1, 8, 16>}]} {
    %c0 = arith.constant 0 : index
    %c0_0 = arith.constant 0 : index
    %c0_1 = arith.constant 0 : index
    %0 = vector.load %arg1[%c0, %c0_0, %c0_1] : memref<1x4x16xf32, #tpu.memory_space<vmem>>, vector<1x4x16xf32>
    %1 = vector.shape_cast %0 : vector<1x4x16xf32> to vector<4x16xf32>
    %c0_2 = arith.constant 0 : index
    %c0_3 = arith.constant 0 : index
    %c0_4 = arith.constant 0 : index
    %2 = vector.load %arg2[%c0_2, %c0_3, %c0_4] : memref<1x4x16xf32, #tpu.memory_space<vmem>>, vector<1x4x16xf32>
    %3 = vector.shape_cast %2 : vector<1x4x16xf32> to vector<4x16xf32>
    %cst = arith.constant 0.000000e+00 : f32
    %4 = vector.broadcast %cst : f32 to vector<4x1xf32>
    %5 = vector.extract_strided_slice %1 {offsets = [0, 0], sizes = [4, 15], strides = [1, 1]} : vector<4x16xf32> to vector<4x15xf32>
    %6 = tpu.concatenate %4, %5 in 1 : vector<4x1xf32>, vector<4x15xf32> -> vector<4x16xf32>
    %7 = vector.extract_strided_slice %1 {offsets = [0, 1], sizes = [4, 15], strides = [1, 1]} : vector<4x16xf32> to vector<4x15xf32>
    %8 = tpu.concatenate %7, %4 in 1 : vector<4x15xf32>, vector<4x1xf32> -> vector<4x16xf32>
    %9 = tpu.concatenate %6, %1, %8 in 0 : vector<4x16xf32>, vector<4x16xf32>, vector<4x16xf32> -> vector<12x16xf32>
    %c0_5 = arith.constant 0 : index
    %c0_6 = arith.constant 0 : index
    %10 = vector.load %arg3[%c0_5, %c0_6] : memref<8x12xf32, #tpu.memory_space<vmem>>, vector<8x12xf32>
    %cst_7 = arith.constant dense<0.000000e+00> : vector<8x16xf32>
    %11 = tpu.matmul %10, %9, %cst_7 {dimension_numbers = #tpu.dot_dimension_numbers<[1], [0], [0], [1], [0, 0, 1, 1], [], []>} : vector<8x12xf32>, vector<12x16xf32>, vector<8x16xf32> -> vector<8x16xf32>
    %c0_8 = arith.constant 0 : index
    %c0_9 = arith.constant 0 : index
    %12 = vector.load %arg4[%c0_8, %c0_9] : memref<8x1xf32, #tpu.memory_space<vmem>>, vector<8x1xf32>
    %13 = vector.broadcast %12 : vector<8x1xf32> to vector<8x16xf32>
    %14 = arith.addf %11, %13 : vector<8x16xf32>
    %cst_10 = arith.constant 0.000000e+00 : f32
    %15 = vector.broadcast %cst_10 : f32 to vector<4x1xf32>
    %16 = vector.extract_strided_slice %3 {offsets = [0, 0], sizes = [4, 15], strides = [1, 1]} : vector<4x16xf32> to vector<4x15xf32>
    %17 = tpu.concatenate %15, %16 in 1 : vector<4x1xf32>, vector<4x15xf32> -> vector<4x16xf32>
    %18 = vector.extract_strided_slice %3 {offsets = [0, 1], sizes = [4, 15], strides = [1, 1]} : vector<4x16xf32> to vector<4x15xf32>
    %19 = tpu.concatenate %18, %15 in 1 : vector<4x15xf32>, vector<4x1xf32> -> vector<4x16xf32>
    %20 = tpu.concatenate %17, %3, %19 in 0 : vector<4x16xf32>, vector<4x16xf32>, vector<4x16xf32> -> vector<12x16xf32>
    %c0_11 = arith.constant 0 : index
    %c0_12 = arith.constant 0 : index
    %21 = vector.load %arg5[%c0_11, %c0_12] : memref<8x12xf32, #tpu.memory_space<vmem>>, vector<8x12xf32>
    %cst_13 = arith.constant dense<0.000000e+00> : vector<8x16xf32>
    %22 = tpu.matmul %21, %20, %cst_13 {dimension_numbers = #tpu.dot_dimension_numbers<[1], [0], [0], [1], [0, 0, 1, 1], [], []>} : vector<8x12xf32>, vector<12x16xf32>, vector<8x16xf32> -> vector<8x16xf32>
    %c0_14 = arith.constant 0 : index
    %c0_15 = arith.constant 0 : index
    %23 = vector.load %arg6[%c0_14, %c0_15] : memref<8x1xf32, #tpu.memory_space<vmem>>, vector<8x1xf32>
    %24 = vector.broadcast %23 : vector<8x1xf32> to vector<8x16xf32>
    %25 = arith.addf %22, %24 : vector<8x16xf32>
    %26 = tpu.concatenate %14, %25 in 0 : vector<8x16xf32>, vector<8x16xf32> -> vector<16x16xf32>
    %cst_16 = arith.constant 0.000000e+00 : f32
    %27 = vector.broadcast %cst_16 : f32 to vector<16x1xf32>
    %28 = vector.extract_strided_slice %26 {offsets = [0, 0], sizes = [16, 15], strides = [1, 1]} : vector<16x16xf32> to vector<16x15xf32>
    %29 = tpu.concatenate %27, %28 in 1 : vector<16x1xf32>, vector<16x15xf32> -> vector<16x16xf32>
    %30 = vector.extract_strided_slice %26 {offsets = [0, 1], sizes = [16, 15], strides = [1, 1]} : vector<16x16xf32> to vector<16x15xf32>
    %31 = tpu.concatenate %30, %27 in 1 : vector<16x15xf32>, vector<16x1xf32> -> vector<16x16xf32>
    %32 = tpu.concatenate %29, %26, %31 in 0 : vector<16x16xf32>, vector<16x16xf32>, vector<16x16xf32> -> vector<48x16xf32>
    %c0_17 = arith.constant 0 : index
    %c0_18 = arith.constant 0 : index
    %33 = vector.load %arg7[%c0_17, %c0_18] : memref<8x48xf32, #tpu.memory_space<vmem>>, vector<8x48xf32>
    %cst_19 = arith.constant dense<0.000000e+00> : vector<8x16xf32>
    %34 = tpu.matmul %33, %32, %cst_19 {dimension_numbers = #tpu.dot_dimension_numbers<[1], [0], [0], [1], [0, 0, 1, 1], [], []>} : vector<8x48xf32>, vector<48x16xf32>, vector<8x16xf32> -> vector<8x16xf32>
    %c0_20 = arith.constant 0 : index
    %c0_21 = arith.constant 0 : index
    %35 = vector.load %arg8[%c0_20, %c0_21] : memref<8x1xf32, #tpu.memory_space<vmem>>, vector<8x1xf32>
    %36 = vector.broadcast %35 : vector<8x1xf32> to vector<8x16xf32>
    %37 = arith.addf %34, %36 : vector<8x16xf32>
    %cst_22 = arith.constant 0.000000e+00 : f32
    %38 = vector.broadcast %cst_22 : f32 to vector<8x16xf32>
    %39 = arith.cmpf ogt, %37, %38 : vector<8x16xf32>
    %cst_23 = arith.constant 0.00999999977 : f32
    %40 = vector.broadcast %cst_23 : f32 to vector<8x16xf32>
    %41 = arith.mulf %40, %37 : vector<8x16xf32>
    %42 = arith.select %39, %37, %41 : vector<8x16xi1>, vector<8x16xf32>
    %cst_24 = arith.constant 0.000000e+00 : f32
    %43 = vector.broadcast %cst_24 : f32 to vector<8x1xf32>
    %44 = vector.extract_strided_slice %42 {offsets = [0, 0], sizes = [8, 15], strides = [1, 1]} : vector<8x16xf32> to vector<8x15xf32>
    %45 = tpu.concatenate %43, %44 in 1 : vector<8x1xf32>, vector<8x15xf32> -> vector<8x16xf32>
    %46 = vector.extract_strided_slice %42 {offsets = [0, 1], sizes = [8, 15], strides = [1, 1]} : vector<8x16xf32> to vector<8x15xf32>
    %47 = tpu.concatenate %46, %43 in 1 : vector<8x15xf32>, vector<8x1xf32> -> vector<8x16xf32>
    %48 = tpu.concatenate %45, %42, %47 in 0 : vector<8x16xf32>, vector<8x16xf32>, vector<8x16xf32> -> vector<24x16xf32>
    %c0_25 = arith.constant 0 : index
    %c0_26 = arith.constant 0 : index
    %49 = vector.load %arg9[%c0_25, %c0_26] : memref<8x24xf32, #tpu.memory_space<vmem>>, vector<8x24xf32>
    %cst_27 = arith.constant dense<0.000000e+00> : vector<8x16xf32>
    %50 = tpu.matmul %49, %48, %cst_27 {dimension_numbers = #tpu.dot_dimension_numbers<[1], [0], [0], [1], [0, 0, 1, 1], [], []>} : vector<8x24xf32>, vector<24x16xf32>, vector<8x16xf32> -> vector<8x16xf32>
    %c0_28 = arith.constant 0 : index
    %c0_29 = arith.constant 0 : index
    %51 = vector.load %arg10[%c0_28, %c0_29] : memref<8x1xf32, #tpu.memory_space<vmem>>, vector<8x1xf32>
    %52 = vector.broadcast %51 : vector<8x1xf32> to vector<8x16xf32>
    %53 = arith.addf %50, %52 : vector<8x16xf32>
    %cst_30 = arith.constant 0.000000e+00 : f32
    %54 = vector.broadcast %cst_30 : f32 to vector<8x16xf32>
    %55 = arith.cmpf ogt, %53, %54 : vector<8x16xf32>
    %cst_31 = arith.constant 0.00999999977 : f32
    %56 = vector.broadcast %cst_31 : f32 to vector<8x16xf32>
    %57 = arith.mulf %56, %53 : vector<8x16xf32>
    %58 = arith.select %55, %53, %57 : vector<8x16xi1>, vector<8x16xf32>
    %c0_32 = arith.constant 0 : index
    %c0_33 = arith.constant 0 : index
    %c0_34 = arith.constant 0 : index
    %59 = vector.load %arg11[%c0_32, %c0_33, %c0_34] : memref<1x8x16xf32, #tpu.memory_space<vmem>>, vector<1x8x16xf32>
    %60 = vector.shape_cast %59 : vector<1x8x16xf32> to vector<8x16xf32>
    %61 = vector.shape_cast %58 : vector<8x16xf32> to vector<1x8x16xf32>
    tpu.vector_store %arg11[%c0_32, %c0_33, %c0_34], %61 {strides = array<i32>} : memref<1x8x16xf32, #tpu.memory_space<vmem>>, vector<1x8x16xf32>,
    return
  }
  func.func @transform_0(%arg0: i32) -> (i32, i32, i32) {
    %c0_i32 = arith.constant 0 : i32
    %c0_i32_0 = arith.constant 0 : i32
    %c0_i32_1 = arith.constant 0 : i32
    return %arg0, %c0_i32, %c0_i32_0 : i32, i32, i32
  }
  func.func @transform_1(%arg0: i32) -> (i32, i32, i32) {
    %c0_i32 = arith.constant 0 : i32
    %c0_i32_0 = arith.constant 0 : i32
    %c0_i32_1 = arith.constant 0 : i32
    return %arg0, %c0_i32, %c0_i32_0 : i32, i32, i32
  }
  func.func @transform_2(%arg0: i32) -> (i32, i32) {
    %c0_i32 = arith.constant 0 : i32
    %c0_i32_0 = arith.constant 0 : i32
    %c0_i32_1 = arith.constant 0 : i32
    return %c0_i32, %c0_i32_0 : i32, i32
  }
  func.func @transform_3(%arg0: i32) -> (i32, i32) {
    %c0_i32 = arith.constant 0 : i32
    %c0_i32_0 = arith.constant 0 : i32
    %c0_i32_1 = arith.constant 0 : i32
    return %c0_i32, %c0_i32_0 : i32, i32
  }
  func.func @transform_4(%arg0: i32) -> (i32, i32) {
    %c0_i32 = arith.constant 0 : i32
    %c0_i32_0 = arith.constant 0 : i32
    %c0_i32_1 = arith.constant 0 : i32
    return %c0_i32, %c0_i32_0 : i32, i32
  }
  func.func @transform_5(%arg0: i32) -> (i32, i32) {
    %c0_i32 = arith.constant 0 : i32
    %c0_i32_0 = arith.constant 0 : i32
    %c0_i32_1 = arith.constant 0 : i32
    return %c0_i32, %c0_i32_0 : i32, i32
  }
  func.func @transform_6(%arg0: i32) -> (i32, i32) {
    %c0_i32 = arith.constant 0 : i32
    %c0_i32_0 = arith.constant 0 : i32
    %c0_i32_1 = arith.constant 0 : i32
    return %c0_i32, %c0_i32_0 : i32, i32
  }
  func.func @transform_7(%arg0: i32) -> (i32, i32) {
    %c0_i32 = arith.constant 0 : i32
    %c0_i32_0 = arith.constant 0 : i32
    %c0_i32_1 = arith.constant 0 : i32
    return %c0_i32, %c0_i32_0 : i32, i32
  }
  func.func @transform_8(%arg0: i32) -> (i32, i32) {
    %c0_i32 = arith.constant 0 : i32
    %c0_i32_0 = arith.constant 0 : i32
    %c0_i32_1 = arith.constant 0 : i32
    return %c0_i32, %c0_i32_0 : i32, i32
  }
  func.func @transform_9(%arg0: i32) -> (i32, i32) {
    %c0_i32 = arith.constant 0 : i32
    %c0_i32_0 = arith.constant 0 : i32
    %c0_i32_1 = arith.constant 0 : i32
    return %c0_i32, %c0_i32_0 : i32, i32
  }
  func.func @transform_10(%arg0: i32) -> (i32, i32, i32) {
    %c0_i32 = arith.constant 0 : i32
    %c0_i32_0 = arith.constant 0 : i32
    %c0_i32_1 = arith.constant 0 : i32
    return %arg0, %c0_i32, %c0_i32_0 : i32, i32, i32
  }
}

</mosaic_0001>

<bundles_post_ra>
// kernel: tpu_custom_call.1
= control target key start
LH: loop header
LB: loop body
LE: loop exit
PB: predicated region body
PF: predicated region fallthrough
CT: control target
= control target key end

     0   :  { %15 = vsyncpa [#allocation3], 0  ;;  %s1273_s0 = inlined_call_operand.vmem [shape: f32[2,4,16], index: 0, kind: input, shape index: {}]   ;;  %s1274_s1 = inlined_call_operand.vmem [shape: f32[2,4,16], index: 1, kind: input, shape index: {}]   ;;  %s1275_s2 = inlined_call_operand.vmem [shape: f32[8,12], index: 2, kind: input, shape index: {}]   ;;  %s1276_s3 = inlined_call_operand.vmem [shape: f32[8,1], index: 3, kind: input, shape index: {}]   ;;  %s1277_s4 = inlined_call_operand.vmem [shape: f32[8,12], index: 4, kind: input, shape index: {}]   ;;  %s1278_s5 = inlined_call_operand.vmem [shape: f32[8,1], index: 5, kind: input, shape index: {}]   ;;  %s1279_s6 = inlined_call_operand.vmem [shape: f32[8,48], index: 6, kind: input, shape index: {}]   ;;  %s1280_s7 = inlined_call_operand.vmem [shape: f32[8,1], index: 7, kind: input, shape index: {}]   ;;  %s1281_s8 = inlined_call_operand.vmem [shape: f32[8,24], index: 8, kind: input, shape index: {}]   ;;  %s1282_s9 = inlined_call_operand.vmem [shape: f32[8,1], index: 9, kind: input, shape index: {}]   ;;  %s1283_s10 = inlined_call_operand.hbm [shape: f32[2,8,16], index: 10, kind: output, shape index: {}]  }
   0x1   :  { %17 = vsyncpa [#allocation3 + $0x1], 0  ;;  %s1100_s13 = smov 0   ;;  %s1102_s14 = smov 0  }
   0x2   :  { %s1104_s15 = smov 0   ;;  %s1106_s16 = smov 0  }
   0x3 LB: > { %s1121_s17 = sadd.s32 4294967295, %s1037_s16   ;;  %s850_s18 = sadd.s32 4294967294, %s1037_s16   ;;  %s1037_s16 = sphi %s1106_s16, %s1291_s16   ;;  %s1033_s15 = sphi %s1104_s15, %s1290_s15   ;;  %s1029_s14 = sphi %s1102_s14, %s1289_s14   ;;  %s1025_s13 = sphi %s1100_s13, %s1288_s13  }
   0x4   : > { %s1125_s19 = sadd.s32 1, %s1037_s16   ;;  %s250_s20 = sadd.s32 1, %s1033_s15 }
   0x5   : > { %s247_s21 = ssub.s32 %s1037_s16, %s1125_s19  ;;  %p260_p0 = scmp.ne.s32.totalorder %s1033_s15, %s1029_s14 }
   0x6   : > { %p248_p1 = scmp.eq.s32.totalorder %s247_s21, 0  ;;  %p261_p2 = scmp.eq.s32.totalorder %s1121_s17, 1 }
   0x7   : > { %p266_p3 = scmp.ne.s32.totalorder %s1029_s14, %s1025_s13  ;;  %p267_p4 = scmp.eq.s32.totalorder %s850_s18, 1 }
   0x8   : > { %s1136_s22 = scalar_select %p248_p1, %s1033_s15, %s250_s20  }
   0x9   : > { %p1138_p5 = por %p261_p2, %p260_p0  ;;  %p1142_p6 = por %p267_p4, %p266_p3 }
   0xa   : > { %p853_p7 = scmp.ge.s32.totalorder %s1037_s16, 1  ;;  %p323_p8 = scmp.lt.s32.totalorder %s1037_s16, 3 }
   0xc   : > { %p324_p9 = pnand %p853_p7, %p323_p8 }
   0xd   : > { %p364_p10 = scmp.lt.s32.totalorder (!%p324_p9), %s1121_s17, 1  ;;  %s1042_s18 = smov (!%p324_p9), 127  }
   0xe   : > { %327 = sbr.rel (%p324_p9) target bundleno = 1000 (0x3e8), region = 60  ;;  %s1043_s20 = smov (!%p324_p9), 1  }
   0xf   : > { %s873_s11 = sshll.u32 (!%p324_p9), %s1121_s17, 7 }
  0x10   : > { %s1238_s27 = scalar_lea.hbm (!%p324_p9), %s1283_s10, %s873_s11 }
  0x13   : > { %v1039_v0 = vmov 0.0   ;;  %s365_s25 = scalar_select %p364_p10, %s1121_s17, 1  ;;  %vm1040_vm0 = vmmov 0   ;;  %v1041_v3 = vmov 0   ;;  %v390_v4 = vld [vmem:[%s1276_s3] sm:$0xff]  ;;  %vm383_vm1 = vcmask 121856  }
  0x14   : > { %893 = vmatprep.subr.mxu1 %v1039_v0  ;;  %907 = vmatprep.subr.mxu0 %v1039_v0  ;;  %v486_v5 = vld [vmem:[%s1278_s5] sm:$0xff]  ;;  %vm387_vm2 = vcmask 1043456   ;;  %vm378_vm3 = vcmask 7168   ;;  %vm396_vm4 = vcmask 97280   ;;  %vm593_vm6 = vcmask 392192   ;;  %s1044_s17 = smov [#allocation2]  }
  0x15   : > { %897 = vmatprep.mubr.msk.f32.mxu1 %vm1040_vm0, %v1039_v0  ;;  %919 = vmatprep.mubr.msk.f32.mxu0 %vm1040_vm0, %v1039_v0  ;;  %s855_s26 = sshll.u32 %s365_s25, 2  ;;  %v389_v15 = vld [vmem:[%s1275_s2] sm:$0xff]  ;;  %vm1207_vm5 = vmneg %vm378_vm3  ;;  %vm686_vm8 = vcmask 195584   ;;  %vm763_vm10 = vcmask 130048   ;;  %s981_s30 = sshll.u32 %s1044_s17, 4  ;;  %s982_s30 = int_to_ptr.vmem [resolvable:$false] %s981_s30 }
  0x16   : > { %s367_s29 = scalar_lea.vmem %s1273_s0, %s855_s26  ;;  %s371_s12 = scalar_lea.vmem %s1274_s1, %s855_s26  ;;  %976 = vset.pattern.permute.xlu1 %v1041_v3  ;;  %975 = vset.pattern.permute.xlu0 %v1041_v3  ;;  %v485_v19 = vld [vmem:[%s1277_s4] sm:$0xff] }
  0x17   : > { %v372_v1 = vld [vmem:[%s367_s29] sm:$0xf] }
  0x18   : > { %v373_v2 = vld [vmem:[%s371_s12] sm:$0xf]  ;;  %380 = vrot.lane.b32.xlu0 %v372_v1, %s1042_s18  ;;  %v385_v9 = vrot.slane %v372_v1, 4 }
  0x19   : > { %478 = vrot.lane.b32.xlu1 %v373_v2, %s1042_s18  ;;  %v482_v10 = vrot.slane %v373_v2, 4  ;;  %v587_v28 = vld [vmem:[%s1280_s7] sm:$0xff] }
  0x1a   : > { %v586_v33 = vld [vmem:[%s1279_s6] sm:$0xff] }
  0x1b   : > { %v680_v41 = vld [vmem:[%s1282_s9] sm:$0xff] }
  0x1c   : > { %375 = vrot.lane.b32.xlu0 %v372_v1, %s1043_s20  ;;  %v679_v43 = vld [vmem:[%s1281_s8] sm:$0xff] }
  0x1d   : > { %474 = vrot.lane.b32.xlu1 %v373_v2, %s1043_s20 }
  0x20   : > { %489 = vperm.xlu0 %975, %v486_v5  }
  0x21   : > { %393 = vperm.xlu1 %976, %v390_v4  }
  0x8a   : > { %v381_v6 = vpop.permute.xlu0 %380 }
  0x8b   : > { %v479_v7 = vpop.permute.xlu1 %478  ;;  %v384_v8 = vsel %vm383_vm1, %v381_v6, 0.0 }
  0x8c   : > { %894 = vmatpush3.msk.msra.mxu1 %vm387_vm2, %v384_v8  ;;  %v481_v17 = vsel %vm383_vm1, %v479_v7, 0.0 }
  0x8d   : > { %895 = vmatprep.subr.mxu1 %v1039_v0 }
  0x8e   : > { %v376_v11 = vpop.permute.xlu0 %375 }
  0x8f   : > { %v475_v12 = vpop.permute.xlu1 %474  ;;  %v379_v13 = vsel %vm378_vm3, 0.0, %v376_v11 }
  0x90   : > { %v477_v14 = vsel %vm378_vm3, 0.0, %v475_v12  ;;  %v388_v16 = vsel %vm387_vm2, %v379_v13, %v385_v9 }
  0x91   : > { %896 = vmatpush3.msra.mxu1 %v388_v16  ;;  %v484_v18 = vsel %vm387_vm2, %v477_v14, %v482_v10 }
  0x92   : > { %898 = vmatmul.mubr.msk.f32.vlgmr.msra.gmra.mxu1 %vm396_vm4, %v389_v15  ;;  %900 = vmatprep.subr.mxu1 %v1039_v0 }
  0x93   : > { %901 = vmatpush3.msk.msra.mxu1 %vm387_vm2, %v481_v17  ;;  %904 = vmatprep.mubr.msk.f32.mxu1 %vm1040_vm0, %v1039_v0 }
  0x94   : > { %902 = vmatprep.subr.mxu1 %v1039_v0 }
  0x95   : > { %903 = vmatpush3.msra.mxu1 %v484_v18 }
  0x96   : > { %905 = vmatmul.mubr.msk.f32.vlgmr.msra.gmra.mxu1 %vm396_vm4, %v485_v19  ;;  %922 = vmatprep.subr.mxu1 %v1039_v0 }
  0x97   : > { %928 = vmatprep.mubr.msk.f32.mxu1 %vm1040_vm0, %v1039_v0 }
  0x9b   : > { %v490_v24 = vpop.permute.xlu0 %489 }
  0x9c   : > { %v394_v20 = vpop.permute.xlu1 %393 }
 0x152   : > { %v469_v21 = vpop.f32.mrf.mxu1 }
 0x153   : > { %v470_v22 = vadd.f32 %v469_v21, %v394_v20 }
 0x154   : > { %v899_v23 = vpop.f32.mrf.mxu1 }
 0x155   : > { %578 = vrot.lane.b32.xlu0 %v470_v22, %s1042_s18 }
 0x156   : > { %v564_v25 = vpop.f32.mrf.mxu1 }
 0x157   : > { %v565_v26 = vadd.f32 %v564_v25, %v490_v24 }
 0x158   : > { %v906_v27 = vpop.f32.mrf.mxu1 }
 0x159   : > { %570 = vrot.lane.b32.xlu0 %v470_v22, %s1043_s20  ;;  %580 = vrot.lane.b32.xlu1 %v565_v26, %s1042_s18 }
 0x15d   : > { %572 = vrot.lane.b32.xlu1 %v565_v26, %s1043_s20 }
 0x161   : > { %590 = vperm.xlu1 %976, %v587_v28  }
 0x1c7   : > { %v579_v30 = vpop.permute.xlu0 %578 }
 0x1cb   : > { %v581_v29 = vpop.permute.xlu1 %580  ;;  %v571_v34 = vpop.permute.xlu0 %570 }
 0x1cc   : > { %908 = vmatpush3.msk.msra.mxu0 %vm383_vm1, %v581_v29 }
 0x1cd   : > { %909 = vmatprep.subr.mxu0 %v1039_v0 }
 0x1ce   : > { %910 = vmatpush3.msk.msra.mxu0 %vm383_vm1, %v579_v30 }
 0x1cf   : > { %911 = vmatprep.subr.mxu0 %v1039_v0  ;;  %v573_v32 = vpop.permute.xlu1 %572 }
 0x1d0   : > { %912 = vmatpush3.msra.mxu0 %v565_v26 }
 0x1d1   : > { %913 = vmatprep.subr.mxu0 %v1039_v0 }
 0x1d2   : > { %914 = vmatpush3.msra.mxu0 %v470_v22 }
 0x1d3   : > { %915 = vmatprep.subr.mxu0 %v1039_v0 }
 0x1d4   : > { %916 = vmatpush3.msk.msra.mxu0 %vm1207_vm5, %v573_v32 }
 0x1d5   : > { %917 = vmatprep.subr.mxu0 %v1039_v0 }
 0x1d6   : > { %918 = vmatpush3.msk.msra.mxu0 %vm1207_vm5, %v571_v34 }
 0x1d7   : > { %920 = vmatmul.mubr.msk.f32.vlgmr.msra.gmra.mxu0 %vm593_vm6, %v586_v33 }
 0x1dc   : > { %v591_v35 = vpop.permute.xlu1 %590 }
 0x297   : > { %v663_v36 = vpop.f32.mrf.mxu0 }
 0x298   : > { %v664_v37 = vadd.f32 %v663_v36, %v591_v35 }
 0x299   : > { %v921_v38 = vpop.f32.mrf.mxu0 }
 0x29a   : > { %v668_v39 = vmul.f32 0.01, %v664_v37  ;;  %vm667_vm7 = vcmp.gt.f32.partialorder %v664_v37, 0.0 }
 0x29c   : > { %v669_v40 = vsel %vm667_vm7, %v664_v37, %v668_v39 }
 0x29d   : > { %671 = vrot.lane.b32.xlu1 %v669_v40, %s1043_s20  ;;  %675 = vrot.lane.b32.xlu0 %v669_v40, %s1042_s18  ;;  %s361_s18 = sand.u32 1, %s1029_s14  }
 0x29e   : > { %s854_s20 = sshll.u32 %s361_s18, 3  ;;  %s766_s28 = scalar_lea.sflag [#allocation3], %s361_s18 }
 0x29f   : > { %s363_s12 = scalar_lea.vmem [#allocation2], %s854_s20  ;;  %s983_s20 = scalar_lea.vmem %s982_s30, 256 }
 0x2a0   : > { %s779_s21 = sshll.u32 %s363_s12, 4  ;;  %s780_s21 = int_to_ptr.vmem [resolvable:$true] %s779_s21 }
 0x2a1   : > { %683 = vperm.xlu0 %975, %v680_v41   ;;  %s977_s29 = scalar_lea.vmem %s780_s21, 128  ;;  %p984_p0 = scmp.lt.s32.totalorder %s780_s21, %s982_s30 }
 0x2a2   : > { %p978_p11 = scmp.ne.s32.totalorder %s780_s21, %s977_s29  ;;  %p985_p1 = scmp.lt.s32.totalorder %s983_s20, %s977_s29 }
 0x2a4   : > { %p979_p12 = pnand %p978_p11, %p1138_p5  ;;  %p986_p2 = por %p985_p1, %p984_p0 }
 0x2a6   : > { %p980_p13 = pneg %p979_p12 }
 0x2a8   : > { %p987_p3 = pnand %p986_p2, %p980_p13 }
 0x30f   : > { %v676_v42 = vpop.permute.xlu0 %675  ;;  %v672_v44 = vpop.permute.xlu1 %671 }
 0x310   : > { %923 = vmatpush3.msk.msra.mxu1 %vm383_vm1, %v676_v42 }
 0x311   : > { %924 = vmatprep.subr.mxu1 %v1039_v0 }
 0x312   : > { %925 = vmatpush3.msra.mxu1 %v669_v40 }
 0x313   : > { %926 = vmatprep.subr.mxu1 %v1039_v0 }
 0x314   : > { %927 = vmatpush3.msk.msra.mxu1 %vm1207_vm5, %v672_v44 }
 0x315   : > { %929 = vmatmul.mubr.msk.f32.vlgmr.msra.gmra.mxu1 %vm686_vm8, %v679_v43 }
 0x31c   : > { %v684_v45 = vpop.permute.xlu0 %683 }
 0x3d5   : > { %v756_v46 = vpop.f32.mrf.mxu1 }
 0x3d6   : > { %v757_v47 = vadd.f32 %v756_v46, %v684_v45 }
 0x3d7   : > { %v930_v48 = vpop.f32.mrf.mxu1 }
 0x3d8   : > { %vm760_vm9 = vcmp.gt.f32.partialorder %v757_v47, 0.0  ;;  %v761_v49 = vmul.f32 0.01, %v757_v47 }
 0x3da   : > { %v762_v50 = vsel %vm760_vm9, %v757_v47, %v761_v49 }
 0x3db   : > { %764 = vst.msk [vmem:[%s363_s12] sm:$0xff] %vm763_vm10, %v762_v50 }
 0x3dc   : > { %990 = shalt.err (!%p987_p3)
}
 0x3dd   : > { %s991_s11 = scalar_lea.hbm %s1238_s27, 128  ;;  %s995_s25 = scalar_lea.hbm %s1283_s10, 256 }
 0x3de   : > { %p992_p4 = scmp.ne.s32.totalorder %s1238_s27, %s991_s11  ;;  %p996_p9 = scmp.lt.s32.totalorder %s1238_s27, %s1283_s10 }
 0x3df   : > { %p997_p10 = scmp.lt.s32.totalorder %s995_s25, %s991_s11 }
 0x3e0   : > { %p993_p7 = pnand %p992_p4, %p1138_p5 }
 0x3e1   : > { %p998_p11 = por %p997_p10, %p996_p9 }
 0x3e2   : > { %p994_p8 = pneg %p993_p7 }
 0x3e4   : > { %p999_p12 = pnand %p998_p11, %p994_p8 }
 0x3e6   : > { %1002 = shalt.err (!%p999_p12)
}
 0x3e7   : > { %931 = dma.vmem_to_hbm [thread:$0]  (%p1138_p5), %s780_s21, 128, %s1238_s27, %s766_s28  }
 0x3e8 PF: > { %p937_p13 = scmp.ge.s32.totalorder %s1037_s16, 2  ;;  %s791_s29 = sand.u32 1, %s1025_s13  }
 0x3e9   : > { %s792_s30 = scalar_lea.sflag [#allocation3], %s791_s29 }
 0x3ea   : > { %p934_p0 = pnand %p937_p13, %p1142_p6 }
 0x3ec   : > { %p935_p1 = pneg %p934_p0 }
 0x3ee   : > { %1020 = dma.done.wait (%p935_p1), %s792_s30, 128  }
 0x3ef   : > { %1022 = vsyncadd (%p935_p1), %s792_s30, 4294967168  ;;  %p20_p2 = scmp.ge.s32.totalorder %s1125_s19, 4   ;;  %s1288_s13 = smov %s1029_s14 }
 0x3f0   : > { %s1289_s14 = smov %s1033_s15  ;;  %s1290_s15 = smov %s1136_s22 }
 0x3f1   : > { %s1291_s16 = smov %s1125_s19  ;;  %22 = sbr.rel (!%p20_p2) target bundleno = 3 (0x3), region = 98 }
 0x3f6   :  { %797 = vsyncpa [#allocation3], 1 }
 0x3f7   :  { %799 = vsyncpa [#allocation3 + $0x1], 1 }

</bundles_post_ra>
